<compile_context>
chip_gen: v7x
topology: tpu7x:2x2x1
jax: 0.10.0
libtpu: 0.0.40
codegen_flags: <defaults>
</compile_context>

<pallas_src>
import jax
import jax.numpy as jnp
from jax.experimental import pallas as pl
from jax.experimental.pallas import tpu as pltpu


def _pad8(c):
    return ((c + 7) // 8) * 8


def _outconv_vpu_kernel(w_ref, b_ref, x_ref, o_ref):
    """Tiny-channel path: unrolled broadcast FMAs on the VPU.

    w_ref: SMEM (C_out, C_in) f32 scalar weights
    b_ref: SMEM (C_out,)      f32 scalar bias
    x_ref: VMEM (bN, C_in, S_t, L)  spatial packed onto (sublane, lane)
    o_ref: VMEM (bN, C_out, S_t, L)

    Each output plane is computed and stored right away: no concatenate, no
    long-lived per-row values.
    """
    b_n = x_ref.shape[0]
    c_in = x_ref.shape[1]
    c_out = o_ref.shape[1]
    for b in range(b_n):                       # static unroll; all counts tiny
        for co in range(c_out):
            acc = x_ref[b, 0].astype(jnp.float32) * w_ref[co, 0]
            for ci in range(1, c_in):
                acc = acc + x_ref[b, ci].astype(jnp.float32) * w_ref[co, ci]
            o_ref[b, co] = (acc + b_ref[co]).astype(o_ref.dtype)


def _outconv_mxu_kernel(w_ref, b_ref, x_ref, o_ref):
    """Mid/large-channel path: one MXU matmul per batch row in the block.

    w_ref: VMEM (C_out, C_in)
    b_ref: VMEM (C_out, 1) f32
    x_ref: VMEM (bN, C_in, T)   spatial on lanes
    o_ref: VMEM (bN, C_out, T)
    """
    # TODO(synk): on v5e, casting x/w tiles to bf16 here (keeping the f32
    # accumulator) gives ~3x MXU throughput if numerics allow; kept exact here.
    b_n = x_ref.shape[0]
    for b in range(b_n):
        y = jnp.dot(w_ref[...], x_ref[b], preferred_element_type=jnp.float32)
        o_ref[b] = (y + b_ref[...]).astype(o_ref.dtype)


def _pick_batch_block(n, hw, n_spatial, max_lanes):
    """Pack several batch images per grid step when spatial is small.

    Amortizes per-step overhead; keeps >= 2 grid steps (megacore) and never
    creates a ragged batch block.
    """
    if n_spatial != 1 or n <= 1 or hw >= 2048:
        return 1
    b_n = min(n, max(1, 2048 // hw), max(1, max_lanes // hw), 8)
    b_n = min(b_n, max(1, n // 2))      # keep >= 2 grid steps for megacore
    while n % b_n:                      # avoid ragged leading-dim blocks
        b_n -= 1
    return max(b_n, 1)


def out_conv(x, weight, bias, *, target_tile_lanes=8192):
    """1x1 Conv2d forward (PyTorch OutConv semantics), NCHW in / NCHW out.

    Args:
      x:      (N, C_in, H, W)
      weight: (C_out, C_in, 1, 1)  (PyTorch Conv2d weight layout)
      bias:   (C_out,)
    Returns:
      (N, C_out, H, W)
    """
    N, C_in, H, W = x.shape
    C_out = weight.shape[0]
    HW = H * W

    w_mat = weight.reshape(C_out, C_in)
    # Only truly tiny contractions stay on the unrolled VPU path.
    use_mxu = (C_in * C_out) >= 32

    # ---- VMEM-aware spatial tile size (in lanes) --------------------------
    try:
        vmem_cap = int(pltpu.get_tpu_info().vmem_capacity_bytes)
    except Exception:
        vmem_cap = 64 << 20                      # conservative (v7x per-TC)
    vmem_limit = min(int(min(vmem_cap, 128 << 20) * 0.85), 100 << 20)
    # Per-lane working set: double-buffered input + output tiles, f32,
    # channel counts padded to a full 8-sublane group.
    bytes_per_lane = 2 * (_pad8(C_in) + _pad8(C_out)) * 4
    budget = vmem_limit // 2                     # headroom for weights/scratch
    max_lanes = max(128, (budget // bytes_per_lane) // 128 * 128)
    tile_lanes = max(128, (min(target_tile_lanes, max_lanes) // 128) * 128)

    if use_mxu:
        # -------- MXU path: (N, C_in, HW), spatial on lanes ---------------
        x_in = x.reshape(N, C_in, HW)
        if HW <= tile_lanes:
            t_sp, n_sp = HW, 1
        else:
            t_sp, n_sp = tile_lanes, pl.cdiv(HW, tile_lanes)
        bN = _pick_batch_block(N, HW, n_sp, max_lanes)
        if pl.cdiv(N, bN) * n_sp < 2 and HW >= 256:     # use both v7x TCs
            t_sp = (((HW + 1) // 2) + 127) // 128 * 128
            n_sp = pl.cdiv(HW, t_sp)
        grid = (pl.cdiv(N, bN), n_sp)
        kernel = _outconv_mxu_kernel
        w_in = w_mat.astype(x.dtype)
        b_in = bias.astype(jnp.float32).reshape(C_out, 1)
        w_spec = pl.BlockSpec((C_out, C_in), lambda n, j: (0, 0))
        b_spec = pl.BlockSpec((C_out, 1), lambda n, j: (0, 0))
        x_spec = pl.BlockSpec((bN, C_in, t_sp), lambda n, j: (n, 0, j))
        o_spec = pl.BlockSpec((bN, C_out, t_sp), lambda n, j: (n, 0, j))
        out_shape = jax.ShapeDtypeStruct((N, C_out, HW), x.dtype)
    else:
        # -------- VPU path: pack spatial onto (sublane, lane) -------------
        if HW % 128 == 0:
            S, L = HW // 128, 128
        else:
            S, L = 1, HW              # rare fallback: lane-only layout
        x_in = x.reshape(N, C_in, S, L)
        if S > 1:
            t_s = max(8, ((tile_lanes // 128) // 8) * 8)
            if t_s >= S:
                t_s, n_sp = S, 1
            else:
                n_sp = pl.cdiv(S, t_s)
            bN = _pick_batch_block(N, HW, n_sp, max_lanes)
            if pl.cdiv(N, bN) * n_sp < 2 and S >= 16:   # use both v7x TCs
                t_s = (((S + 1) // 2) + 7) // 8 * 8
                n_sp = pl.cdiv(S, t_s)
            x_spec = pl.BlockSpec((bN, C_in, t_s, L), lambda n, j: (n, 0, j, 0))
            o_spec = pl.BlockSpec((bN, C_out, t_s, L), lambda n, j: (n, 0, j, 0))
        else:
            if HW <= tile_lanes:
                t_l, n_sp = HW, 1
            else:
                t_l, n_sp = tile_lanes, pl.cdiv(HW, tile_lanes)
            bN = _pick_batch_block(N, HW, n_sp, max_lanes)
            if pl.cdiv(N, bN) * n_sp < 2 and HW >= 256:
                t_l = (((HW + 1) // 2) + 127) // 128 * 128
                n_sp = pl.cdiv(HW, t_l)
            x_spec = pl.BlockSpec((bN, C_in, 1, t_l), lambda n, j: (n, 0, 0, j))
            o_spec = pl.BlockSpec((bN, C_out, 1, t_l), lambda n, j: (n, 0, 0, j))
        grid = (pl.cdiv(N, bN), n_sp)
        kernel = _outconv_vpu_kernel
        # SMEM is 32-bit scalar memory: force f32 scalars.
        w_in = w_mat.astype(jnp.float32)
        b_in = bias.astype(jnp.float32)
        w_spec = pl.BlockSpec(memory_space=pltpu.MemorySpace.SMEM)
        b_spec = pl.BlockSpec(memory_space=pltpu.MemorySpace.SMEM)
        out_shape = jax.ShapeDtypeStruct((N, C_out, S, L), x.dtype)

    cost = pl.CostEstimate(
        flops=2 * N * HW * C_in * C_out,
        transcendentals=0,
        bytes_accessed=int(x.dtype.itemsize) * (N * HW * (C_in + C_out))
        + 4 * (C_in * C_out + C_out),
    )

    y = pl.pallas_call(
        kernel,
        out_shape=out_shape,
        grid_spec=pltpu.PrefetchScalarGridSpec(
            num_scalar_prefetch=0,
            grid=grid,
            in_specs=[w_spec, b_spec, x_spec],
            out_specs=o_spec,
        ),
        compiler_params=pltpu.CompilerParams(
            dimension_semantics=("parallel", "parallel"),
            vmem_limit_bytes=int(vmem_limit),
        ),
        cost_estimate=cost,
    )(w_in, b_in, x_in)

    return y.reshape(N, C_out, H, W)


def _ref_out_conv(x, weight, bias):
    c_out, c_in = weight.shape[0], weight.shape[1]
    return (jnp.einsum("nchw,oc->nohw", x, weight.reshape(c_out, c_in))
            + bias.reshape(1, c_out, 1, 1))


def _make_case(key, n, c_in, c_out, h, w):
    k_x, k_w, k_b = jax.random.split(key, 3)
    x = jax.random.normal(k_x, (n, c_in, h, w), dtype=jnp.float32)
    bound = 1.0 / (c_in ** 0.5)
    weight = jax.random.uniform(k_w, (c_out, c_in, 1, 1), jnp.float32,
                                minval=-bound, maxval=bound)
    bias = jax.random.uniform(k_b, (c_out,), jnp.float32,
                              minval=-bound, maxval=bound)
    return x, weight, bias


if __name__ == "__main__":
    key = jax.random.PRNGKey(0)
    keys = jax.random.split(key, 5)

    # A) Tiny channels, packed VPU path (N=2, 4->3, 16x16).
    x, w, b = _make_case(keys[0], 2, 4, 3, 16, 16)
    y = out_conv(x, w, b)
    jax.block_until_ready(y)
    assert y.shape == (2, 3, 16, 16)
    assert jnp.allclose(y, _ref_out_conv(x, w, b), atol=1e-5, rtol=1e-5)

    # B) Mid channels, MXU path (N=2, 32->16, 16x16).
    x, w, b = _make_case(keys[1], 2, 32, 16, 16, 16)
    y = out_conv(x, w, b)
    jax.block_until_ready(y)
    assert y.shape == (2, 16, 16, 16)
    assert jnp.allclose(y, _ref_out_conv(x, w, b), atol=1e-4, rtol=1e-4)

    # C) Ragged lane tiles: HW=400 not a multiple of the forced 128-lane tile.
    x, w, b = _make_case(keys[2], 1, 4, 3, 20, 20)
    y = out_conv(x, w, b, target_tile_lanes=128)
    jax.block_until_ready(y)
    assert y.shape == (1, 3, 20, 20)
    assert jnp.allclose(y, _ref_out_conv(x, w, b), atol=1e-5, rtol=1e-5)

    # D) Packed VPU path with ragged sublane tile + forced 2-step spatial split
    #    for N=1 (HW=2304 -> S=18 sublane rows, tile_s=16).
    x, w, b = _make_case(keys[3], 1, 4, 3, 48, 48)
    y = out_conv(x, w, b)
    jax.block_until_ready(y)
    assert y.shape == (1, 3, 48, 48)
    assert jnp.allclose(y, _ref_out_conv(x, w, b), atol=1e-5, rtol=1e-5)

    # E) Docstring example shape: 128 -> 1 output channel (MXU path).
    x, w, b = _make_case(keys[4], 2, 128, 1, 16, 16)
    y = out_conv(x, w, b)
    jax.block_until_ready(y)
    assert y.shape == (2, 1, 16, 16)
    assert jnp.allclose(y, _ref_out_conv(x, w, b), atol=1e-4, rtol=1e-4)

    print("KERNEL_OK")
</pallas_src>

<mosaic_0001>
module attributes {stable_mosaic.version = 11 : i64} {
  func.func @_outconv_vpu_kernel(%arg0: i32, %arg1: i32, %arg2: memref<3x4xf32, #tpu.memory_space<smem>>, %arg3: memref<3xf32, #tpu.memory_space<smem>>, %arg4: memref<1x4x2x128xf32, #tpu.memory_space<vmem>>, %arg5: memref<1x3x2x128xf32, #tpu.memory_space<vmem>>) attributes {dimension_semantics = [#tpu.dimension_semantics<parallel>, #tpu.dimension_semantics<parallel>], iteration_bounds = array<i64: 2, 1>, scalar_prefetch = 0 : i64, scratch_operands = 0 : i64, tpu.core_type = #tpu.core_type<tc>, window_params = [{transform_indices = @transform_0, window_bounds = array<i64: 3, 4>}, {transform_indices = @transform_1, window_bounds = array<i64: 3>}, {transform_indices = @transform_2, window_bounds = array<i64: 1, 4, 2, 128>}, {transform_indices = @transform_3, window_bounds = array<i64: 1, 3, 2, 128>}]} {
    %c0 = arith.constant 0 : index
    %c0_0 = arith.constant 0 : index
    %c0_1 = arith.constant 0 : index
    %c0_2 = arith.constant 0 : index
    %0 = vector.load %arg4[%c0, %c0_0, %c0_1, %c0_2] : memref<1x4x2x128xf32, #tpu.memory_space<vmem>>, vector<1x1x2x128xf32>
    %1 = vector.shape_cast %0 : vector<1x1x2x128xf32> to vector<2x128xf32>
    %c0_3 = arith.constant 0 : index
    %c0_4 = arith.constant 0 : index
    %2 = memref.load %arg2[%c0_3, %c0_4] : memref<3x4xf32, #tpu.memory_space<smem>>
    %3 = vector.broadcast %2 : f32 to vector<2x128xf32>
    %4 = arith.mulf %1, %3 : vector<2x128xf32>
    %c0_5 = arith.constant 0 : index
    %c1 = arith.constant 1 : index
    %c0_6 = arith.constant 0 : index
    %c0_7 = arith.constant 0 : index
    %5 = vector.load %arg4[%c0_5, %c1, %c0_6, %c0_7] : memref<1x4x2x128xf32, #tpu.memory_space<vmem>>, vector<1x1x2x128xf32>
    %6 = vector.shape_cast %5 : vector<1x1x2x128xf32> to vector<2x128xf32>
    %c0_8 = arith.constant 0 : index
    %c1_9 = arith.constant 1 : index
    %7 = memref.load %arg2[%c0_8, %c1_9] : memref<3x4xf32, #tpu.memory_space<smem>>
    %8 = vector.broadcast %7 : f32 to vector<2x128xf32>
    %9 = arith.mulf %6, %8 : vector<2x128xf32>
    %10 = arith.addf %4, %9 : vector<2x128xf32>
    %c0_10 = arith.constant 0 : index
    %c2 = arith.constant 2 : index
    %c0_11 = arith.constant 0 : index
    %c0_12 = arith.constant 0 : index
    %11 = vector.load %arg4[%c0_10, %c2, %c0_11, %c0_12] : memref<1x4x2x128xf32, #tpu.memory_space<vmem>>, vector<1x1x2x128xf32>
    %12 = vector.shape_cast %11 : vector<1x1x2x128xf32> to vector<2x128xf32>
    %c0_13 = arith.constant 0 : index
    %c2_14 = arith.constant 2 : index
    %13 = memref.load %arg2[%c0_13, %c2_14] : memref<3x4xf32, #tpu.memory_space<smem>>
    %14 = vector.broadcast %13 : f32 to vector<2x128xf32>
    %15 = arith.mulf %12, %14 : vector<2x128xf32>
    %16 = arith.addf %10, %15 : vector<2x128xf32>
    %c0_15 = arith.constant 0 : index
    %c3 = arith.constant 3 : index
    %c0_16 = arith.constant 0 : index
    %c0_17 = arith.constant 0 : index
    %17 = vector.load %arg4[%c0_15, %c3, %c0_16, %c0_17] : memref<1x4x2x128xf32, #tpu.memory_space<vmem>>, vector<1x1x2x128xf32>
    %18 = vector.shape_cast %17 : vector<1x1x2x128xf32> to vector<2x128xf32>
    %c0_18 = arith.constant 0 : index
    %c3_19 = arith.constant 3 : index
    %19 = memref.load %arg2[%c0_18, %c3_19] : memref<3x4xf32, #tpu.memory_space<smem>>
    %20 = vector.broadcast %19 : f32 to vector<2x128xf32>
    %21 = arith.mulf %18, %20 : vector<2x128xf32>
    %22 = arith.addf %16, %21 : vector<2x128xf32>
    %c0_20 = arith.constant 0 : index
    %23 = memref.load %arg3[%c0_20] : memref<3xf32, #tpu.memory_space<smem>>
    %24 = vector.broadcast %23 : f32 to vector<2x128xf32>
    %25 = arith.addf %22, %24 : vector<2x128xf32>
    %c0_21 = arith.constant 0 : index
    %c0_22 = arith.constant 0 : index
    %c0_23 = arith.constant 0 : index
    %c0_24 = arith.constant 0 : index
    %26 = vector.load %arg5[%c0_21, %c0_22, %c0_23, %c0_24] : memref<1x3x2x128xf32, #tpu.memory_space<vmem>>, vector<1x1x2x128xf32>
    %27 = vector.shape_cast %26 : vector<1x1x2x128xf32> to vector<2x128xf32>
    %28 = vector.shape_cast %25 : vector<2x128xf32> to vector<1x1x2x128xf32>
    tpu.vector_store %arg5[%c0_21, %c0_22, %c0_23, %c0_24], %28 {strides = array<i32>} : memref<1x3x2x128xf32, #tpu.memory_space<vmem>>, vector<1x1x2x128xf32>,
    %c0_25 = arith.constant 0 : index
    %c0_26 = arith.constant 0 : index
    %c0_27 = arith.constant 0 : index
    %c0_28 = arith.constant 0 : index
    %29 = vector.load %arg4[%c0_25, %c0_26, %c0_27, %c0_28] : memref<1x4x2x128xf32, #tpu.memory_space<vmem>>, vector<1x1x2x128xf32>
    %30 = vector.shape_cast %29 : vector<1x1x2x128xf32> to vector<2x128xf32>
    %c1_29 = arith.constant 1 : index
    %c0_30 = arith.constant 0 : index
    %31 = memref.load %arg2[%c1_29, %c0_30] : memref<3x4xf32, #tpu.memory_space<smem>>
    %32 = vector.broadcast %31 : f32 to vector<2x128xf32>
    %33 = arith.mulf %30, %32 : vector<2x128xf32>
    %c0_31 = arith.constant 0 : index
    %c1_32 = arith.constant 1 : index
    %c0_33 = arith.constant 0 : index
    %c0_34 = arith.constant 0 : index
    %34 = vector.load %arg4[%c0_31, %c1_32, %c0_33, %c0_34] : memref<1x4x2x128xf32, #tpu.memory_space<vmem>>, vector<1x1x2x128xf32>
    %35 = vector.shape_cast %34 : vector<1x1x2x128xf32> to vector<2x128xf32>
    %c1_35 = arith.constant 1 : index
    %c1_36 = arith.constant 1 : index
    %36 = memref.load %arg2[%c1_35, %c1_36] : memref<3x4xf32, #tpu.memory_space<smem>>
    %37 = vector.broadcast %36 : f32 to vector<2x128xf32>
    %38 = arith.mulf %35, %37 : vector<2x128xf32>
    %39 = arith.addf %33, %38 : vector<2x128xf32>
    %c0_37 = arith.constant 0 : index
    %c2_38 = arith.constant 2 : index
    %c0_39 = arith.constant 0 : index
    %c0_40 = arith.constant 0 : index
    %40 = vector.load %arg4[%c0_37, %c2_38, %c0_39, %c0_40] : memref<1x4x2x128xf32, #tpu.memory_space<vmem>>, vector<1x1x2x128xf32>
    %41 = vector.shape_cast %40 : vector<1x1x2x128xf32> to vector<2x128xf32>
    %c1_41 = arith.constant 1 : index
    %c2_42 = arith.constant 2 : index
    %42 = memref.load %arg2[%c1_41, %c2_42] : memref<3x4xf32, #tpu.memory_space<smem>>
    %43 = vector.broadcast %42 : f32 to vector<2x128xf32>
    %44 = arith.mulf %41, %43 : vector<2x128xf32>
    %45 = arith.addf %39, %44 : vector<2x128xf32>
    %c0_43 = arith.constant 0 : index
    %c3_44 = arith.constant 3 : index
    %c0_45 = arith.constant 0 : index
    %c0_46 = arith.constant 0 : index
    %46 = vector.load %arg4[%c0_43, %c3_44, %c0_45, %c0_46] : memref<1x4x2x128xf32, #tpu.memory_space<vmem>>, vector<1x1x2x128xf32>
    %47 = vector.shape_cast %46 : vector<1x1x2x128xf32> to vector<2x128xf32>
    %c1_47 = arith.constant 1 : index
    %c3_48 = arith.constant 3 : index
    %48 = memref.load %arg2[%c1_47, %c3_48] : memref<3x4xf32, #tpu.memory_space<smem>>
    %49 = vector.broadcast %48 : f32 to vector<2x128xf32>
    %50 = arith.mulf %47, %49 : vector<2x128xf32>
    %51 = arith.addf %45, %50 : vector<2x128xf32>
    %c1_49 = arith.constant 1 : index
    %52 = memref.load %arg3[%c1_49] : memref<3xf32, #tpu.memory_space<smem>>
    %53 = vector.broadcast %52 : f32 to vector<2x128xf32>
    %54 = arith.addf %51, %53 : vector<2x128xf32>
    %c0_50 = arith.constant 0 : index
    %c1_51 = arith.constant 1 : index
    %c0_52 = arith.constant 0 : index
    %c0_53 = arith.constant 0 : index
    %55 = vector.load %arg5[%c0_50, %c1_51, %c0_52, %c0_53] : memref<1x3x2x128xf32, #tpu.memory_space<vmem>>, vector<1x1x2x128xf32>
    %56 = vector.shape_cast %55 : vector<1x1x2x128xf32> to vector<2x128xf32>
    %57 = vector.shape_cast %54 : vector<2x128xf32> to vector<1x1x2x128xf32>
    tpu.vector_store %arg5[%c0_50, %c1_51, %c0_52, %c0_53], %57 {strides = array<i32>} : memref<1x3x2x128xf32, #tpu.memory_space<vmem>>, vector<1x1x2x128xf32>,
    %c0_54 = arith.constant 0 : index
    %c0_55 = arith.constant 0 : index
    %c0_56 = arith.constant 0 : index
    %c0_57 = arith.constant 0 : index
    %58 = vector.load %arg4[%c0_54, %c0_55, %c0_56, %c0_57] : memref<1x4x2x128xf32, #tpu.memory_space<vmem>>, vector<1x1x2x128xf32>
    %59 = vector.shape_cast %58 : vector<1x1x2x128xf32> to vector<2x128xf32>
    %c2_58 = arith.constant 2 : index
    %c0_59 = arith.constant 0 : index
    %60 = memref.load %arg2[%c2_58, %c0_59] : memref<3x4xf32, #tpu.memory_space<smem>>
    %61 = vector.broadcast %60 : f32 to vector<2x128xf32>
    %62 = arith.mulf %59, %61 : vector<2x128xf32>
    %c0_60 = arith.constant 0 : index
    %c1_61 = arith.constant 1 : index
    %c0_62 = arith.constant 0 : index
    %c0_63 = arith.constant 0 : index
    %63 = vector.load %arg4[%c0_60, %c1_61, %c0_62, %c0_63] : memref<1x4x2x128xf32, #tpu.memory_space<vmem>>, vector<1x1x2x128xf32>
    %64 = vector.shape_cast %63 : vector<1x1x2x128xf32> to vector<2x128xf32>
    %c2_64 = arith.constant 2 : index
    %c1_65 = arith.constant 1 : index
    %65 = memref.load %arg2[%c2_64, %c1_65] : memref<3x4xf32, #tpu.memory_space<smem>>
    %66 = vector.broadcast %65 : f32 to vector<2x128xf32>
    %67 = arith.mulf %64, %66 : vector<2x128xf32>
    %68 = arith.addf %62, %67 : vector<2x128xf32>
    %c0_66 = arith.constant 0 : index
    %c2_67 = arith.constant 2 : index
    %c0_68 = arith.constant 0 : index
    %c0_69 = arith.constant 0 : index
    %69 = vector.load %arg4[%c0_66, %c2_67, %c0_68, %c0_69] : memref<1x4x2x128xf32, #tpu.memory_space<vmem>>, vector<1x1x2x128xf32>
    %70 = vector.shape_cast %69 : vector<1x1x2x128xf32> to vector<2x128xf32>
    %c2_70 = arith.constant 2 : index
    %c2_71 = arith.constant 2 : index
    %71 = memref.load %arg2[%c2_70, %c2_71] : memref<3x4xf32, #tpu.memory_space<smem>>
    %72 = vector.broadcast %71 : f32 to vector<2x128xf32>
    %73 = arith.mulf %70, %72 : vector<2x128xf32>
    %74 = arith.addf %68, %73 : vector<2x128xf32>
    %c0_72 = arith.constant 0 : index
    %c3_73 = arith.constant 3 : index
    %c0_74 = arith.constant 0 : index
    %c0_75 = arith.constant 0 : index
    %75 = vector.load %arg4[%c0_72, %c3_73, %c0_74, %c0_75] : memref<1x4x2x128xf32, #tpu.memory_space<vmem>>, vector<1x1x2x128xf32>
    %76 = vector.shape_cast %75 : vector<1x1x2x128xf32> to vector<2x128xf32>
    %c2_76 = arith.constant 2 : index
    %c3_77 = arith.constant 3 : index
    %77 = memref.load %arg2[%c2_76, %c3_77] : memref<3x4xf32, #tpu.memory_space<smem>>
    %78 = vector.broadcast %77 : f32 to vector<2x128xf32>
    %79 = arith.mulf %76, %78 : vector<2x128xf32>
    %80 = arith.addf %74, %79 : vector<2x128xf32>
    %c2_78 = arith.constant 2 : index
    %81 = memref.load %arg3[%c2_78] : memref<3xf32, #tpu.memory_space<smem>>
    %82 = vector.broadcast %81 : f32 to vector<2x128xf32>
    %83 = arith.addf %80, %82 : vector<2x128xf32>
    %c0_79 = arith.constant 0 : index
    %c2_80 = arith.constant 2 : index
    %c0_81 = arith.constant 0 : index
    %c0_82 = arith.constant 0 : index
    %84 = vector.load %arg5[%c0_79, %c2_80, %c0_81, %c0_82] : memref<1x3x2x128xf32, #tpu.memory_space<vmem>>, vector<1x1x2x128xf32>
    %85 = vector.shape_cast %84 : vector<1x1x2x128xf32> to vector<2x128xf32>
    %86 = vector.shape_cast %83 : vector<2x128xf32> to vector<1x1x2x128xf32>
    tpu.vector_store %arg5[%c0_79, %c2_80, %c0_81, %c0_82], %86 {strides = array<i32>} : memref<1x3x2x128xf32, #tpu.memory_space<vmem>>, vector<1x1x2x128xf32>,
    return
  }
  func.func @transform_0(%arg0: i32, %arg1: i32) -> (i32, i32) {
    %c0_i32 = arith.constant 0 : i32
    %c0_i32_0 = arith.constant 0 : i32
    %c0_i32_1 = arith.constant 0 : i32
    return %c0_i32, %c0_i32_0 : i32, i32
  }
  func.func @transform_1(%arg0: i32, %arg1: i32) -> i32 {
    %c0_i32 = arith.constant 0 : i32
    %c0_i32_0 = arith.constant 0 : i32
    return %c0_i32 : i32
  }
  func.func @transform_2(%arg0: i32, %arg1: i32) -> (i32, i32, i32, i32) {
    %c0_i32 = arith.constant 0 : i32
    %c0_i32_0 = arith.constant 0 : i32
    %c0_i32_1 = arith.constant 0 : i32
    return %arg0, %c0_i32, %arg1, %c0_i32_0 : i32, i32, i32, i32
  }
  func.func @transform_3(%arg0: i32, %arg1: i32) -> (i32, i32, i32, i32) {
    %c0_i32 = arith.constant 0 : i32
    %c0_i32_0 = arith.constant 0 : i32
    %c0_i32_1 = arith.constant 0 : i32
    return %arg0, %c0_i32, %arg1, %c0_i32_0 : i32, i32, i32, i32
  }
}

</mosaic_0001>

<bundles_post_ra>
// kernel: tpu_custom_call.1
= control target key start
LH: loop header
LB: loop body
LE: loop exit
PB: predicated region body
PF: predicated region fallthrough
CT: control target
= control target key end

     0   :  { %8 = vsyncpa [#allocation5], 0  ;;  %s1001_s0 = inlined_call_operand.hbm [shape: f32[3,4], index: 0, kind: input, shape index: {}]   ;;  %s1002_s1 = inlined_call_operand.vmem [shape: f32[3], index: 1, kind: input, shape index: {}]   ;;  %s1003_s2 = inlined_call_operand.hbm [shape: f32[2,4,2,128], index: 2, kind: input, shape index: {}]   ;;  %s1004_s3 = inlined_call_operand.hbm [shape: f32[2,3,2,128], index: 3, kind: output, shape index: {}]  }
   0x1   :  { %9 = vsyncpa [#allocation6], 0 }
   0x2   :  { %10 = vsyncpa [#allocation3], 0 }
   0x3   :  { %12 = vsyncpa [#allocation3 + $0x1], 0 }
   0x4   :  { %13 = vsyncpa [#allocation4], 0 }
   0x5   :  { %15 = vsyncpa [#allocation4 + $0x1], 0  ;;  %s737_s12 = smov 0   ;;  %s739_s13 = smov 0  }
   0x6   :  { %s741_s14 = smov 0   ;;  %s743_s15 = smov 0  }
   0x7   :  { %s745_s16 = smov 0   ;;  %s747_s17 = smov 0  }
   0x8 LB: > { %s429_s18 = sadd.s32 4294967295, %s707_s17   ;;  %s430_s19 = sadd.s32 4294967294, %s707_s17   ;;  %s707_s17 = sphi %s747_s17, %s21_s17   ;;  %s703_s16 = sphi %s745_s16, %s1025_s16   ;;  %s699_s15 = sphi %s743_s15, %s1024_s15   ;;  %s695_s14 = sphi %s741_s14, %s1023_s14   ;;  %s691_s13 = sphi %s739_s13, %s1022_s13   ;;  %s687_s12 = sphi %s737_s12, %s1021_s12  }
   0x9   : > { %s84_s20 = sadd.s32 1, %s695_s14  ;;  %p91_p0 = scmp.ne.s32.totalorder %s695_s14, %s691_s13 }
   0xa   : > { %p92_p1 = scmp.eq.s32.totalorder %s707_s17, 0  ;;  %p97_p2 = scmp.ne.s32.totalorder %s691_s13, %s687_s12 }
   0xb   : > { %p775_p3 = scmp.eq.s32.totalorder %s429_s18, 0  ;;  %p123_p4 = scmp.eq.s32.totalorder %s429_s18, 1 }
   0xc   : > { %p93_p5 = por %p92_p1, %p91_p0  ;;  %p129_p6 = scmp.eq.s32.totalorder %s430_s19, 1 }
   0xd   : > { %s1009_s21 = scalar_select %p775_p3, 1, 0 }
   0xe   : > { %p781_p7 = por %p775_p3, %p97_p2  ;;  %p785_p8 = por %p123_p4, %p91_p0 }
   0xf   : > { %p789_p9 = por %p129_p6, %p97_p2  ;;  %p431_p10 = scmp.ge.s32.totalorder %s707_s17, 1 }
  0x10   : > { %s1010_s22 = scalar_select %p781_p7, 1, 0 }
  0x11   : > { %s1011_s23 = scalar_select %p785_p8, 1, 0 }
  0x12   : > { %s1012_s24 = scalar_select %p789_p9, 1, 0 }
  0x13   : > { %p136_p11 = scmp.lt.s32.totalorder %s707_s17, 3  ;;  %p501_p1 = scmp.lt.s32.totalorder %s707_s17, 2 }
  0x14   : > { %s158_s28 = sshll.u32 %s1002_s1, 4  ;;  %s169_s4 = sand.u32 1, %s695_s14   ;;  %s159_s28 = int_to_ptr.vmem [resolvable:$true] %s158_s28 }
  0x15   : > { %p796_p13 = pnand %p431_p10, %p136_p11  ;;  %p806_p4 = pnand %p501_p1, %p93_p5 }
  0x16   : > { %s33_s5 = sadd.s32 1, %s703_s16  ;;  %s559_s8 = scalar_lea.hbm %s1001_s0, 64 }
  0x17   : > { %p484_p0 = pneg %p796_p13  ;;  %p560_p5 = scmp.ne.s32.totalorder %s1001_s0, %s559_s8 }
  0x18   : > { %p566_p1 = scmp.lt.u32.totalorder %s559_s8, %s1001_s0 }
  0x19   : > { %p812_p2 = pnand %p484_p0, %p775_p3 }
  0x1b   : > { %p561_p6 = pneg %p812_p2 }
  0x1d   : > { %p562_p10 = pnand %p561_p6, %p560_p5 }
  0x1f   : > { %p563_p11 = pneg %p562_p10 }
  0x21   : > { %p568_p0 = pnand %p566_p1, %p563_p11 }
  0x23   : > { %571 = shalt.err (!%p568_p0)
}
  0x24   : > { %s709_s19 = smov [#allocation2]   ;;  %s572_s6 = scalar_lea.vmem %s159_s28, 16 }
  0x25   : > { %487 = dma.hbm_to_smem (!%p812_p2), %s1001_s0, 64, %s709_s19, [#allocation5]  }
  0x26   : > { %p573_p12 = scmp.ne.s32.totalorder %s159_s28, %s572_s6  ;;  %p580_p7 = scmp.lt.s32.totalorder %s159_s28, %s159_s28 }
  0x27   : > { %p581_p5 = scmp.lt.s32.totalorder %s572_s6, %s572_s6 }
  0x28   : > { %p575_p9 = pnand %p573_p12, %p561_p6 }
  0x29   : > { %p582_p10 = por %p581_p5, %p580_p7 }
  0x2a   : > { %p576_p8 = pneg %p575_p9 }
  0x2c   : > { %p583_p3 = pnand %p582_p10, %p576_p8 }
  0x2e   : > { %586 = shalt.err (!%p583_p3)
}
  0x2f   : > { %s710_s7 = smov [#allocation7]   ;;  %p35_p11 = scmp.ge.s32.totalorder %s33_s5, 2 }
  0x30   : > { %490 = dma.vmem_to_smem (!%p812_p2), %s159_s28, 16, %s710_s7, [#allocation6]  }
  0x31   : > { %s435_s8 = sshll.u32 %s169_s4, 3  ;;  %s469_s9 = sshll.u32 %s703_s16, 7 }
  0x32   : > { %s1027_s5 = smov (%p35_p11, %s33_s5), 0  ;;  %s844_s30 = scalar_lea.hbm %s1003_s2, %s469_s9 }
  0x33   : > { %s79_s18 = ssub.s32 %s703_s16, %s1027_s5  ;;  %s173_s19 = scalar_lea.vmem [#allocation8], %s435_s8 }
  0x34   : > { %s181_s28 = sshll.u32 %s173_s19, 4  ;;  %p82_p3 = scmp.eq.s32.totalorder %s79_s18, 0  ;;  %s848_s28 = int_to_ptr.vmem [resolvable:$true] %s181_s28 }
  0x35   : > { %s857_s27 = scalar_lea.sflag [#allocation3], %s169_s4  ;;  %s587_s6 = scalar_lea.hbm %s844_s30, 128 }
  0x36   : > { %s853_s26 = scalar_select %p82_p3, %s695_s14, %s84_s20  }
  0x37   : > { %p588_p7 = scmp.ne.s32.totalorder %s844_s30, %s587_s6  ;;  %p589_p8 = pneg %p806_p4 }
  0x38   : > { %s592_s9 = scalar_lea.hbm %s1003_s2, 256  ;;  %p593_p2 = scmp.lt.u32.totalorder %s844_s30, %s1003_s2 }
  0x39   : > { %p590_p9 = pnand %p589_p8, %p588_p7  ;;  %p594_p6 = scmp.lt.u32.totalorder %s592_s9, %s587_s6 }
  0x3a   : > { %p596_p0 = scmp.lt.u32.totalorder %s587_s6, %s844_s30 }
  0x3b   : > { %p591_p12 = pneg %p590_p9  ;;  %p595_p1 = por %p594_p6, %p593_p2 }
  0x3d   : > { %p597_p5 = por %p596_p0, %p595_p1 }
  0x3f   : > { %p598_p10 = pnand %p597_p5, %p591_p12 }
  0x41   : > { %601 = shalt.err (!%p598_p10)
}
  0x42   : > { %s602_s20 = scalar_lea.vmem %s848_s28, 128  ;;  %s711_s4 = smov [#allocation8]  }
  0x43   : > { %p603_p11 = scmp.ne.s32.totalorder %s848_s28, %s602_s20  ;;  %s607_s18 = sshll.u32 %s711_s4, 4  ;;  %s608_s18 = int_to_ptr.vmem [resolvable:$false] %s607_s18 }
  0x44   : > { %s609_s19 = scalar_lea.vmem %s608_s18, 256  ;;  %p610_p9 = scmp.lt.s32.totalorder %s848_s28, %s608_s18 }
  0x45   : > { %p605_p3 = pnand %p603_p11, %p589_p8  ;;  %p611_p2 = scmp.lt.s32.totalorder %s609_s19, %s602_s20 }
  0x47   : > { %p606_p7 = pneg %p605_p3  ;;  %p612_p6 = por %p611_p2, %p610_p9 }
  0x49   : > { %p613_p1 = pnand %p612_p6, %p606_p7 }
  0x4b   : > { %616 = shalt.err (!%p613_p1)
}
  0x4c   : > { %s712_s6 = smov 32   ;;  %s713_s7 = smov 2  }
  0x4d   : > { %494 = dma.hbm_to_vmem [thread:$0]  (!%p806_p4), %s844_s30, 128, %s848_s28, %s857_s27, %s712_s6, %s712_s6, %s713_s7  }
  0x4e   : > { %193 = sbr.rel (%p796_p13) target bundleno = 132 (0x84), region = 32  ;;  %p1016_p8 = scmp.ne.s32.totalorder (!%p796_p13), %s1009_s21, 0 }
  0x55   : > { %670 = dma.done.wait (%p1016_p8), [#allocation5], 64  }
  0x56   : > { %672 = vsyncadd (%p1016_p8), [#allocation5], 4294967232 }
  0x57   : > { %674 = dma.done.wait (%p1016_p8), [#allocation6], 16  }
  0x58   : > { %676 = vsyncadd (%p1016_p8), [#allocation6], 4294967280  ;;  %s896_s8 = sand.u32 1, %s691_s13   ;;  %p1017_p13 = scmp.ne.s32.totalorder %s1010_s22, 0 }
  0x59   : > { %s441_s25 = sshll.u32 %s896_s8, 3  ;;  %s204_s29 = scalar_lea.sflag [#allocation3], %s896_s8 }
  0x5a   : > { %s900_s30 = scalar_lea.vmem [#allocation8], %s441_s25 }
  0x5b   : > { %678 = dma.done.wait (%p1017_p13), %s204_s29, 128  }
  0x5c   : > { %680 = vsyncadd (%p1017_p13), %s204_s29, 4294967168 }
  0x5d   : > { %212 = sfence }
  0x5e   : > { %s232_s28 = sld [smem:[#allocation2]]  ;;  %s443_s21 = sld [smem:[#allocation2 + $0x1]]  ;;  %v231_v0 = vld [vmem:[%s900_s30] sm:$0x3]  ;;  %v442_v1 = vld [vmem:[%s900_s30 + $0x2] sm:$0x3] }
  0x5f   : > { %s445_s27 = sld [smem:[#allocation2 + $0x2]]  ;;  %s447_s9 = sld [smem:[#allocation2 + $0x3]]  ;;  %v444_v3 = vld [vmem:[%s900_s30 + $0x4] sm:$0x3]  ;;  %v446_v6 = vld [vmem:[%s900_s30 + $0x6] sm:$0x3] }
  0x60   : > { %s448_s10 = sld [smem:[#allocation2 + $0x80]]  ;;  %s450_s20 = sld [smem:[#allocation2 + $0x81]]  ;;  %v257_v9 = vld [vmem:[%s900_s30] sm:$0x3]  ;;  %v449_v12 = vld [vmem:[%s900_s30 + $0x2] sm:$0x3] }
  0x61   : > { %s908_s11 = sld [smem:[#allocation7]]  ;;  %s911_s22 = sld [smem:[#allocation2 + $0x82]]  ;;  %v451_v16 = vld [vmem:[%s900_s30 + $0x4] sm:$0x3]  ;;  %v453_v17 = vld [vmem:[%s900_s30 + $0x6] sm:$0x3] }
  0x62   : > { %s913_s4 = sld [smem:[#allocation2 + $0x83]]  ;;  %s916_s18 = sld [smem:[#allocation2 + $0x100]]  ;;  %v281_v20 = vld [vmem:[%s900_s30] sm:$0x3]  ;;  %v458_v25 = vld [vmem:[%s900_s30 + $0x2] sm:$0x3] }
  0x63   : > { %s919_s19 = sld [smem:[#allocation2 + $0x101]]  ;;  %s921_s6 = sld [smem:[#allocation2 + $0x102]]  ;;  %v460_v30 = vld [vmem:[%s900_s30 + $0x4] sm:$0x3]  ;;  %v462_v35 = vld [vmem:[%s900_s30 + $0x6] sm:$0x3] }
  0x64   : > { %v233_v2 = vstv %s232_s28  ;;  %v238_v5 = vstv %s443_s21  ;;  %s924_s7 = sld [smem:[#allocation7 + $0x1]]  ;;  %s926_s25 = sld [smem:[#allocation2 + $0x103]] }
  0x65   : > { %v234_v4 = vmul.f32 %v233_v2, %v231_v0  ;;  %v239_v7 = vmul.f32 %v442_v1, %v238_v5  ;;  %v244_v8 = vstv %s445_s27  ;;  %v250_v11 = vstv %s447_s9  ;;  %s470_s29 = smul.u32 6, %s896_s8  ;;  %s935_s28 = sld [smem:[#allocation7 + $0x2]] }
  0x66   : > { %v245_v10 = vmul.f32 %v444_v3, %v244_v8  ;;  %v251_v14 = vmul.f32 %v446_v6, %v250_v11  ;;  %v259_v15 = vstv %s448_s10  ;;  %v263_v19 = vstv %s450_s20  ;;  %s471_s9 = smul.u32 96, %s699_s15  ;;  %s306_s20 = scalar_lea.sflag [#allocation4], %s896_s8 }
  0x67   : > { %v240_v13 = vadd.f32 %v239_v7, %v234_v4  ;;  %v260_v18 = vmul.f32 %v259_v15, %v257_v9  ;;  %v264_v22 = vmul.f32 %v449_v12, %v263_v19  ;;  %v268_v23 = vstv %s911_s22  ;;  %s230_s21 = scalar_lea.vmem [#allocation9], %s470_s29  ;;  %p1018_p12 = scmp.ne.s32.totalorder %s1011_s23, 0 }
  0x68   : > { %v273_v24 = vstv %s913_s4  ;;  %v254_v26 = vstv %s908_s11  ;;  %v269_v27 = vmul.f32 %v451_v16, %v268_v23  ;;  %v283_v29 = vstv %s916_s18  ;;  %s320_s27 = sshll.u32 %s230_s21, 4  ;;  %s952_s11 = scalar_lea.hbm %s1004_s3, %s471_s9  ;;  %s947_s27 = int_to_ptr.vmem [resolvable:$true] %s320_s27 }
  0x69   : > { %v246_v21 = vadd.f32 %v245_v10, %v240_v13  ;;  %v274_v28 = vmul.f32 %v453_v17, %v273_v24  ;;  %v265_v32 = vadd.f32 %v264_v22, %v260_v18  ;;  %v284_v33 = vmul.f32 %v283_v29, %v281_v20  ;;  %s617_s22 = scalar_lea.vmem %s947_s27, 96  ;;  %s714_s15 = smov [#allocation9]  }
  0x6a   : > { %v287_v34 = vstv %s919_s19  ;;  %v292_v37 = vstv %s921_s6  ;;  %v297_v38 = vstv %s926_s25  ;;  %v277_v42 = vstv %s924_s7  ;;  %p618_p4 = scmp.ne.s32.totalorder %s947_s27, %s617_s22  ;;  %s621_s4 = sshll.u32 %s714_s15, 4  ;;  %s622_s4 = int_to_ptr.vmem [resolvable:$false] %s621_s4 }
  0x6b   : > { %v252_v31 = vadd.f32 %v251_v14, %v246_v21  ;;  %v288_v36 = vmul.f32 %v458_v25, %v287_v34  ;;  %v270_v40 = vadd.f32 %v269_v27, %v265_v32  ;;  %v293_v41 = vmul.f32 %v460_v30, %v292_v37  ;;  %s623_s18 = scalar_lea.vmem %s622_s4, 192  ;;  %p624_p10 = scmp.lt.s32.totalorder %s947_s27, %s622_s4 }
  0x6c   : > { %v298_v44 = vmul.f32 %v462_v35, %v297_v38  ;;  %v301_v48 = vstv %s935_s28  ;;  %p619_p0 = pnand %p618_p4, %p1018_p12  ;;  %p625_p11 = scmp.lt.s32.totalorder %s623_s18, %s617_s22 }
  0x6d   : > { %v255_v39 = vadd.f32 %v254_v26, %v252_v31  ;;  %v289_v43 = vadd.f32 %v288_v36, %v284_v33  ;;  %v275_v45 = vadd.f32 %v274_v28, %v270_v40 }
  0x6e   : > { %p620_p5 = pneg %p619_p0  ;;  %p626_p3 = por %p625_p11, %p624_p10 }
  0x6f   : > { %256 = vst [vmem:[%s230_s21] sm:$0x3] %v255_v39  ;;  %v294_v46 = vadd.f32 %v293_v41, %v289_v43  ;;  %v278_v47 = vadd.f32 %v277_v42, %v275_v45 }
  0x70   : > { %p627_p7 = pnand %p626_p3, %p620_p5 }
  0x71   : > { %v299_v49 = vadd.f32 %v298_v44, %v294_v46  ;;  %456 = vst [vmem:[%s230_s21 + $0x2] sm:$0x3] %v278_v47 }
  0x73   : > { %v302_v50 = vadd.f32 %v301_v48, %v299_v49 }
  0x75   : > { %465 = vst [vmem:[%s230_s21 + $0x4] sm:$0x3] %v302_v50 }
  0x76   : > { %630 = shalt.err (!%p627_p7)
}
  0x77   : > { %s631_s19 = scalar_lea.hbm %s952_s11, 96  ;;  %s635_s25 = scalar_lea.hbm %s1004_s3, 192 }
  0x78   : > { %p632_p9 = scmp.ne.s32.totalorder %s952_s11, %s631_s19  ;;  %p636_p1 = scmp.lt.u32.totalorder %s952_s11, %s1004_s3 }
  0x79   : > { %p637_p8 = scmp.lt.u32.totalorder %s635_s25, %s631_s19  ;;  %p639_p4 = scmp.lt.u32.totalorder %s631_s19, %s952_s11 }
  0x7a   : > { %p633_p2 = pnand %p632_p9, %p1018_p12 }
  0x7b   : > { %p638_p13 = por %p637_p8, %p636_p1 }
  0x7c   : > { %p634_p6 = pneg %p633_p2 }
  0x7d   : > { %p640_p0 = por %p639_p4, %p638_p13 }
  0x7f   : > { %p641_p5 = pnand %p640_p0, %p634_p6 }
  0x81   : > { %644 = shalt.err (!%p641_p5)
}
  0x82   : > { %s715_s21 = smov 32   ;;  %s716_s9 = smov 2  }
  0x83   : > { %482 = dma.vmem_to_hbm [thread:$0]  (%p1018_p12), %s947_s27, 96, %s952_s11, %s306_s20, %s715_s21, %s715_s21, %s716_s9  }
  0x84 PF: > { %s335_s30 = sand.u32 1, %s687_s12   ;;  %p1019_p10 = scmp.ne.s32.totalorder %s1012_s24, 0 }
  0x85   : > { %p1020_p11 = scmp.ge.s32.totalorder %s707_s17, 2  ;;  %s336_s10 = scalar_lea.sflag [#allocation4], %s335_s30 }
  0x87   : > { %p496_p3 = pnand %p1020_p11, %p1019_p10 }
  0x89   : > { %682 = dma.done.wait (!%p496_p3), %s336_s10, 96  }
  0x8a   : > { %684 = vsyncadd (!%p496_p3), %s336_s10, 4294967200  ;;  %s21_s17 = sadd.s32 1, %s707_s17   ;;  %s1021_s12 = smov %s691_s13 }
  0x8b   : > { %p18_p7 = scmp.ge.s32.totalorder %s21_s17, 4   ;;  %s1022_s13 = smov %s695_s14 }
  0x8c   : > { %s1023_s14 = smov %s853_s26  ;;  %s1024_s15 = smov %s703_s16 }
  0x8d   : > { %s1025_s16 = smov %s1027_s5  ;;  %20 = sbr.rel (!%p18_p7) target bundleno = 8 (0x8), region = 92 }
  0x94   :  { %341 = vsyncpa [#allocation3], 1 }
  0x95   :  { %343 = vsyncpa [#allocation3 + $0x1], 1 }
  0x96   :  { %344 = vsyncpa [#allocation4], 1 }
  0x97   :  { %346 = vsyncpa [#allocation4 + $0x1], 1 }
  0x98   :  { %347 = vsyncpa [#allocation5], 1 }
  0x99   :  { %349 = vsyncpa [#allocation5 + $0x1], 1 }
  0x9a   :  { %350 = vsyncpa [#allocation6], 1 }
  0x9b   :  { %352 = vsyncpa [#allocation6 + $0x1], 1 }

</bundles_post_ra>
